<compile_context>
chip_gen: v7x
topology: tpu7x:2x2x1
jax: 0.10.0
libtpu: 0.0.40
codegen_flags: <defaults>
</compile_context>

<pallas_src>
import jax
import jax.numpy as jnp
from jax import lax
from jax.experimental import pallas as pl
from jax.experimental.pallas import tpu as pltpu


def _make_cbam_kernel(H, W, K):
    """Build the per-image kernel. H, W: spatial dims; K: spatial-conv kernel size."""
    HW = H * W
    halo = (K - 1) // 2
    # Lane-aligned zero halo on each side of a flattened (row-major) map so every
    # conv tap is a static in-bounds slice.
    PAD = ((halo * (W + 1) + 127) // 128) * 128

    def kernel(x_ref, w1t_ref, w2m_ref, ws_ref, wb_ref, o_ref, pad_ref):
        # x_ref / o_ref: (C, H*W)  VMEM, lane-dense, one batch element
        # w1t_ref:       (C, Ci)   VMEM  -- transpose of Conv2d(C, Ci, 1).weight[:, :, 0, 0]
        # w2m_ref:       (C, Ci)   VMEM  -- Conv2d(Ci, C, 1).weight[:, :, 0, 0]
        # ws_ref:        (2, K, K) SMEM  -- Conv2d(2, 1, K).weight[0]
        # wb_ref:        (1,)      SMEM  -- Conv2d(2, 1, K).bias
        # pad_ref:       (2, PAD + H*W + PAD) VMEM scratch (padded conv input rows)
        C = x_ref.shape[0]
        x2 = x_ref[...].astype(jnp.float32)                # force f32 accumulation

        # ---------------- channel attention ----------------
        mx = jnp.max(x2, axis=1, keepdims=True)            # (C, 1) lane reduction
        av = jnp.sum(x2, axis=1, keepdims=True) * (1.0 / HW)

        w1t = w1t_ref[...]                                  # (C, Ci)
        w2m = w2m_ref[...]                                  # (C, Ci)

        def layer1(p):  # (C, 1) -> (1, Ci):  relu(W1 @ p)
            return jnp.maximum(jnp.sum(w1t * p, axis=0, keepdims=True), 0.0)

        # Second 1x1 conv is linear -> shared across the two pooling branches.
        hid = layer1(mx) + layer1(av)                       # (1, Ci)
        ch_att = jax.nn.sigmoid(jnp.sum(w2m * hid, axis=1, keepdims=True))   # (C, 1)
        x_ch = x2 * ch_att                                  # (C, HW) lane-dense gate

        # ---------------- spatial attention ----------------
        # Write channel max / mean into zero-padded scratch rows (aligned stores),
        # then the KxK conv is K*K*2 static-offset slices + FMAs.
        pad_ref[...] = jnp.zeros(pad_ref.shape, pad_ref.dtype)
        pad_ref[0:1, PAD:PAD + HW] = jnp.max(x_ch, axis=0, keepdims=True)
        pad_ref[1:2, PAD:PAD + HW] = jnp.sum(x_ch, axis=0, keepdims=True) * (1.0 / C)

        # Output-column masks for taps whose flat shift would wrap across rows.
        col = lax.broadcasted_iota(jnp.int32, (1, HW), 1) % W
        masks = []
        for kw in range(K):
            dw = kw - halo
            if dw == 0:
                masks.append(None)
            else:
                valid = (col + dw >= 0) & (col + dw < W)
                masks.append(jnp.where(valid, 1.0, 0.0))

        acc = jnp.full((1, HW), wb_ref[0], jnp.float32)     # bias
        for c in range(2):
            for kw in range(K):
                part = None
                for kh in range(K):
                    s = PAD + (kh - halo) * W + (kw - halo)
                    term = ws_ref[c, kh, kw] * pad_ref[c:c + 1, s:s + HW]
                    part = term if part is None else part + term
                if masks[kw] is not None:
                    part = part * masks[kw]
                acc = acc + part

        sp_att = jax.nn.sigmoid(acc)                        # (1, HW)
        o_ref[...] = (x_ch * sp_att).astype(o_ref.dtype)

    return kernel, PAD


def cbam_pallas(x, w1t, w2m, ws, wb):
    B, C, H, W = x.shape
    Ci = w1t.shape[1]
    K = ws.shape[-1]
    HW = H * W

    kernel, pad = _make_cbam_kernel(H, W, K)
    x_flat = x.reshape(B, C, HW)        # free (row-major) reshape -> lane-dense blocks

    # Double-buffered in+out blocks plus intermediates; keep headroom, cap for v7x.
    block_bytes = C * HW * x.dtype.itemsize
    vmem_limit = int(min(max(8 * block_bytes + (4 << 20), 32 << 20), 64 << 20))

    out_flat = pl.pallas_call(
        kernel,
        out_shape=jax.ShapeDtypeStruct((B, C, HW), x.dtype),
        grid=(B,),
        in_specs=[
            pl.BlockSpec((None, C, HW), lambda b: (b, 0, 0)),   # batch dim squeezed
            pl.BlockSpec((C, Ci), lambda b: (0, 0)),
            pl.BlockSpec((C, Ci), lambda b: (0, 0)),
            pl.BlockSpec(memory_space=pltpu.MemorySpace.SMEM),  # (2,K,K) conv weights
            pl.BlockSpec(memory_space=pltpu.MemorySpace.SMEM),  # (1,) conv bias
        ],
        out_specs=pl.BlockSpec((None, C, HW), lambda b: (b, 0, 0)),
        scratch_shapes=[pltpu.VMEM((2, pad + HW + pad), jnp.float32)],
        compiler_params=pltpu.CompilerParams(
            dimension_semantics=("parallel",),
            vmem_limit_bytes=vmem_limit),
    )(x_flat, w1t, w2m, ws, wb)
    return out_flat.reshape(B, C, H, W)


def cbam_ref(x, w1t, w2m, ws, wb):
    """Pure-JAX reference matching the PyTorch CBAMBlock forward."""
    mx = jnp.max(x, axis=(2, 3))                             # (B, C)
    av = jnp.mean(x, axis=(2, 3))                            # (B, C)

    def fc(p):
        h = jax.nn.relu(p @ w1t)                             # (B, Ci)
        return h @ w2m.T                                     # (B, C)

    ch = jax.nn.sigmoid(fc(mx) + fc(av))
    xc = x * ch[:, :, None, None]

    cmax = jnp.max(xc, axis=1, keepdims=True)
    cmean = jnp.mean(xc, axis=1, keepdims=True)
    sp_in = jnp.concatenate([cmax, cmean], axis=1)           # (B, 2, H, W)
    sp = lax.conv_general_dilated(
        sp_in, ws[None], window_strides=(1, 1), padding="SAME",
        dimension_numbers=("NCHW", "OIHW", "NCHW")) + wb[0]
    return xc * jax.nn.sigmoid(sp)


if __name__ == "__main__":
    B, C, H, W = 2, 4, 16, 16
    reduction, ksize = 16, 3
    Ci = max(C // reduction, 1)

    key = jax.random.PRNGKey(0)
    k1, k2, k3, k4, k5 = jax.random.split(key, 5)
    x = jax.random.normal(k1, (B, C, H, W), jnp.float32)
    # Parameters (shapes from the module __init__):
    #   Conv2d(C, Ci, 1, bias=False) -> pass transposed (C, Ci)
    #   Conv2d(Ci, C, 1, bias=False) -> (C, Ci)
    #   Conv2d(2, 1, 3, padding=1)   -> weight (2, 3, 3), bias (1,)
    w1t = 0.5 * jax.random.normal(k2, (C, Ci), jnp.float32)
    w2m = 0.5 * jax.random.normal(k3, (C, Ci), jnp.float32)
    ws = 0.5 * jax.random.normal(k4, (2, ksize, ksize), jnp.float32)
    wb = 0.1 * jax.random.normal(k5, (1,), jnp.float32)

    out = cbam_pallas(x, w1t, w2m, ws, wb)
    jax.block_until_ready(out)

    ref = cbam_ref(x, w1t, w2m, ws, wb)
    assert out.shape == x.shape and out.dtype == x.dtype
    err = jnp.max(jnp.abs(out - ref))
    if not jnp.allclose(out, ref, atol=1e-5, rtol=1e-4):
        raise AssertionError(f"mismatch vs JAX reference, max abs err={err}")
    print("KERNEL_OK")
</pallas_src>

<mosaic_0001>
module attributes {stable_mosaic.version = 11 : i64} {
  func.func @kernel(%arg0: i32, %arg1: memref<1x4x256xf32, #tpu.memory_space<vmem>>, %arg2: memref<4x1xf32, #tpu.memory_space<vmem>>, %arg3: memref<4x1xf32, #tpu.memory_space<vmem>>, %arg4: memref<2x3x3xf32, #tpu.memory_space<smem>>, %arg5: memref<1xf32, #tpu.memory_space<smem>>, %arg6: memref<1x4x256xf32, #tpu.memory_space<vmem>>, %arg7: memref<2x512xf32, #tpu.memory_space<vmem>>) attributes {dimension_semantics = [#tpu.dimension_semantics<parallel>], iteration_bounds = array<i64: 2>, scalar_prefetch = 0 : i64, scratch_operands = 1 : i64, tpu.core_type = #tpu.core_type<tc>, window_params = [{transform_indices = @transform_0, window_bounds = array<i64: 1, 4, 256>}, {pipeline_mode = #tpu.pipeline_mode<synchronous>, transform_indices = @transform_1, window_bounds = array<i64: 4, 1>}, {pipeline_mode = #tpu.pipeline_mode<synchronous>, transform_indices = @transform_2, window_bounds = array<i64: 4, 1>}, {transform_indices = @transform_3, window_bounds = array<i64: 2, 3, 3>}, {transform_indices = @transform_4, window_bounds = array<i64: 1>}, {transform_indices = @transform_5, window_bounds = array<i64: 1, 4, 256>}]} {
    %c0 = arith.constant 0 : index
    %c0_0 = arith.constant 0 : index
    %c0_1 = arith.constant 0 : index
    %0 = vector.load %arg1[%c0, %c0_0, %c0_1] : memref<1x4x256xf32, #tpu.memory_space<vmem>>, vector<1x4x256xf32>
    %1 = vector.shape_cast %0 : vector<1x4x256xf32> to vector<4x256xf32>
    %cst = arith.constant dense<0xFF800000> : vector<4xf32>
    %2 = vector.multi_reduction <maximumf>, %1, %cst [1] : vector<4x256xf32> to vector<4xf32>
    %3 = vector.shape_cast %2 : vector<4xf32> to vector<4x1xf32>
    %cst_2 = arith.constant dense<0.000000e+00> : vector<4xf32>
    %4 = vector.multi_reduction <add>, %1, %cst_2 [1] : vector<4x256xf32> to vector<4xf32>
    %5 = vector.shape_cast %4 : vector<4xf32> to vector<4x1xf32>
    %cst_3 = arith.constant 3.906250e-03 : f32
    %6 = vector.broadcast %cst_3 : f32 to vector<4x1xf32>
    %7 = arith.mulf %5, %6 : vector<4x1xf32>
    %c0_4 = arith.constant 0 : index
    %c0_5 = arith.constant 0 : index
    %8 = vector.load %arg2[%c0_4, %c0_5] : memref<4x1xf32, #tpu.memory_space<vmem>>, vector<4x1xf32>
    %c0_6 = arith.constant 0 : index
    %c0_7 = arith.constant 0 : index
    %9 = vector.load %arg3[%c0_6, %c0_7] : memref<4x1xf32, #tpu.memory_space<vmem>>, vector<4x1xf32>
    %10 = arith.mulf %8, %3 : vector<4x1xf32>
    %cst_8 = arith.constant dense<0.000000e+00> : vector<1xf32>
    %11 = vector.multi_reduction <add>, %10, %cst_8 [0] : vector<4x1xf32> to vector<1xf32>
    %12 = vector.shape_cast %11 : vector<1xf32> to vector<1x1xf32>
    %cst_9 = arith.constant 0.000000e+00 : f32
    %13 = vector.broadcast %cst_9 : f32 to vector<1x1xf32>
    %14 = arith.maximumf %12, %13 : vector<1x1xf32>
    %15 = arith.mulf %8, %7 : vector<4x1xf32>
    %cst_10 = arith.constant dense<0.000000e+00> : vector<1xf32>
    %16 = vector.multi_reduction <add>, %15, %cst_10 [0] : vector<4x1xf32> to vector<1xf32>
    %17 = vector.shape_cast %16 : vector<1xf32> to vector<1x1xf32>
    %cst_11 = arith.constant 0.000000e+00 : f32
    %18 = vector.broadcast %cst_11 : f32 to vector<1x1xf32>
    %19 = arith.maximumf %17, %18 : vector<1x1xf32>
    %20 = arith.addf %14, %19 : vector<1x1xf32>
    %21 = vector.broadcast %20 : vector<1x1xf32> to vector<4x1xf32>
    %22 = arith.mulf %9, %21 : vector<4x1xf32>
    %cst_12 = arith.constant dense<0.000000e+00> : vector<4xf32>
    %23 = vector.multi_reduction <add>, %22, %cst_12 [1] : vector<4x1xf32> to vector<4xf32>
    %24 = vector.shape_cast %23 : vector<4xf32> to vector<4x1xf32>
    %25 = arith.negf %24 : vector<4x1xf32>
    %26 = math.exp %25 : vector<4x1xf32>
    %cst_13 = arith.constant 1.000000e+00 : f32
    %27 = vector.broadcast %cst_13 : f32 to vector<4x1xf32>
    %28 = arith.addf %27, %26 : vector<4x1xf32>
    %29 = arith.divf %27, %28 : vector<4x1xf32>
    %30 = vector.broadcast %29 : vector<4x1xf32> to vector<4x256xf32>
    %31 = arith.mulf %1, %30 : vector<4x256xf32>
    %cst_14 = arith.constant 0.000000e+00 : f32
    %32 = vector.broadcast %cst_14 : f32 to vector<2x512xf32>
    %c0_15 = arith.constant 0 : index
    %c0_16 = arith.constant 0 : index
    %33 = vector.load %arg7[%c0_15, %c0_16] : memref<2x512xf32, #tpu.memory_space<vmem>>, vector<2x512xf32>
    tpu.vector_store %arg7[%c0_15, %c0_16], %32 {strides = array<i32>} : memref<2x512xf32, #tpu.memory_space<vmem>>, vector<2x512xf32>,
    %cst_17 = arith.constant dense<0xFF800000> : vector<256xf32>
    %34 = vector.multi_reduction <maximumf>, %31, %cst_17 [0] : vector<4x256xf32> to vector<256xf32>
    %35 = vector.shape_cast %34 : vector<256xf32> to vector<1x256xf32>
    %c0_18 = arith.constant 0 : index
    %c128 = arith.constant 128 : index
    %36 = vector.load %arg7[%c0_18, %c128] : memref<2x512xf32, #tpu.memory_space<vmem>>, vector<1x256xf32>
    tpu.vector_store %arg7[%c0_18, %c128], %35 {strides = array<i32>} : memref<2x512xf32, #tpu.memory_space<vmem>>, vector<1x256xf32>,
    %cst_19 = arith.constant dense<0.000000e+00> : vector<256xf32>
    %37 = vector.multi_reduction <add>, %31, %cst_19 [0] : vector<4x256xf32> to vector<256xf32>
    %38 = vector.shape_cast %37 : vector<256xf32> to vector<1x256xf32>
    %cst_20 = arith.constant 2.500000e-01 : f32
    %39 = vector.broadcast %cst_20 : f32 to vector<1x256xf32>
    %40 = arith.mulf %38, %39 : vector<1x256xf32>
    %c1 = arith.constant 1 : index
    %c128_21 = arith.constant 128 : index
    %41 = vector.load %arg7[%c1, %c128_21] : memref<2x512xf32, #tpu.memory_space<vmem>>, vector<1x256xf32>
    tpu.vector_store %arg7[%c1, %c128_21], %40 {strides = array<i32>} : memref<2x512xf32, #tpu.memory_space<vmem>>, vector<1x256xf32>,
    %42 = tpu.iota {dimensions = array<i32: 1>} : vector<1x256xi32>
    %c16_i32 = arith.constant 16 : i32
    %c0_i32 = arith.constant 0 : i32
    %43 = arith.cmpi eq, %c16_i32, %c0_i32 : i32
    %c1_i32 = arith.constant 1 : i32
    %44 = arith.select %43, %c1_i32, %c16_i32 : i32
    %45 = vector.broadcast %44 : i32 to vector<1x256xi32>
    %46 = arith.remsi %42, %45 : vector<1x256xi32>
    %c0_i32_22 = arith.constant 0 : i32
    %47 = vector.broadcast %c0_i32_22 : i32 to vector<1x256xi32>
    %48 = arith.cmpi ne, %46, %47 : vector<1x256xi32>
    %c0_i32_23 = arith.constant 0 : i32
    %49 = vector.broadcast %c0_i32_23 : i32 to vector<1x256xi32>
    %50 = arith.cmpi slt, %46, %49 : vector<1x256xi32>
    %c0_i32_24 = arith.constant 0 : i32
    %51 = arith.cmpi slt, %44, %c0_i32_24 : i32
    %52 = vector.broadcast %51 : i1 to vector<1x256xi1>
    %53 = vector.broadcast %52 : vector<1x256xi1> to vector<1x256xi1>
    %54 = arith.xori %50, %53 : vector<1x256xi1>
    %55 = arith.andi %54, %48 : vector<1x256xi1>
    %56 = vector.broadcast %44 : i32 to vector<1x256xi32>
    %57 = arith.addi %46, %56 : vector<1x256xi32>
    %58 = arith.select %55, %57, %46 : vector<1x256xi1>, vector<1x256xi32>
    %c-1_i32 = arith.constant -1 : i32
    %59 = vector.broadcast %c-1_i32 : i32 to vector<1x256xi32>
    %60 = arith.addi %58, %59 : vector<1x256xi32>
    %c0_i32_25 = arith.constant 0 : i32
    %61 = vector.broadcast %c0_i32_25 : i32 to vector<1x256xi32>
    %62 = arith.cmpi sge, %60, %61 : vector<1x256xi32>
    %c-1_i32_26 = arith.constant -1 : i32
    %63 = vector.broadcast %c-1_i32_26 : i32 to vector<1x256xi32>
    %64 = arith.addi %58, %63 : vector<1x256xi32>
    %c16_i32_27 = arith.constant 16 : i32
    %65 = vector.broadcast %c16_i32_27 : i32 to vector<1x256xi32>
    %66 = arith.cmpi slt, %64, %65 : vector<1x256xi32>
    %67 = arith.andi %62, %66 : vector<1x256xi1>
    %cst_28 = arith.constant 1.000000e+00 : f32
    %cst_29 = arith.constant 0.000000e+00 : f32
    %68 = vector.broadcast %cst_28 : f32 to vector<1x256xf32>
    %69 = vector.broadcast %cst_29 : f32 to vector<1x256xf32>
    %70 = arith.select %67, %68, %69 : vector<1x256xi1>, vector<1x256xf32>
    %c1_i32_30 = arith.constant 1 : i32
    %71 = vector.broadcast %c1_i32_30 : i32 to vector<1x256xi32>
    %72 = arith.addi %58, %71 : vector<1x256xi32>
    %c0_i32_31 = arith.constant 0 : i32
    %73 = vector.broadcast %c0_i32_31 : i32 to vector<1x256xi32>
    %74 = arith.cmpi sge, %72, %73 : vector<1x256xi32>
    %c1_i32_32 = arith.constant 1 : i32
    %75 = vector.broadcast %c1_i32_32 : i32 to vector<1x256xi32>
    %76 = arith.addi %58, %75 : vector<1x256xi32>
    %c16_i32_33 = arith.constant 16 : i32
    %77 = vector.broadcast %c16_i32_33 : i32 to vector<1x256xi32>
    %78 = arith.cmpi slt, %76, %77 : vector<1x256xi32>
    %79 = arith.andi %74, %78 : vector<1x256xi1>
    %cst_34 = arith.constant 1.000000e+00 : f32
    %cst_35 = arith.constant 0.000000e+00 : f32
    %80 = vector.broadcast %cst_34 : f32 to vector<1x256xf32>
    %81 = vector.broadcast %cst_35 : f32 to vector<1x256xf32>
    %82 = arith.select %79, %80, %81 : vector<1x256xi1>, vector<1x256xf32>
    %c0_36 = arith.constant 0 : index
    %83 = memref.load %arg5[%c0_36] : memref<1xf32, #tpu.memory_space<smem>>
    %84 = vector.broadcast %83 : f32 to vector<1x256xf32>
    %c0_37 = arith.constant 0 : index
    %c0_38 = arith.constant 0 : index
    %c0_39 = arith.constant 0 : index
    %85 = memref.load %arg4[%c0_37, %c0_38, %c0_39] : memref<2x3x3xf32, #tpu.memory_space<smem>>
    %c0_40 = arith.constant 0 : index
    %c111 = arith.constant 111 : index
    %86 = vector.load %arg7[%c0_40, %c111] : memref<2x512xf32, #tpu.memory_space<vmem>>, vector<1x256xf32>
    %87 = vector.broadcast %85 : f32 to vector<1x256xf32>
    %88 = arith.mulf %87, %86 : vector<1x256xf32>
    %c0_41 = arith.constant 0 : index
    %c1_42 = arith.constant 1 : index
    %c0_43 = arith.constant 0 : index
    %89 = memref.load %arg4[%c0_41, %c1_42, %c0_43] : memref<2x3x3xf32, #tpu.memory_space<smem>>
    %c0_44 = arith.constant 0 : index
    %c127 = arith.constant 127 : index
    %90 = vector.load %arg7[%c0_44, %c127] : memref<2x512xf32, #tpu.memory_space<vmem>>, vector<1x256xf32>
    %91 = vector.broadcast %89 : f32 to vector<1x256xf32>
    %92 = arith.mulf %91, %90 : vector<1x256xf32>
    %93 = arith.addf %88, %92 : vector<1x256xf32>
    %c0_45 = arith.constant 0 : index
    %c2 = arith.constant 2 : index
    %c0_46 = arith.constant 0 : index
    %94 = memref.load %arg4[%c0_45, %c2, %c0_46] : memref<2x3x3xf32, #tpu.memory_space<smem>>
    %c0_47 = arith.constant 0 : index
    %c143 = arith.constant 143 : index
    %95 = vector.load %arg7[%c0_47, %c143] : memref<2x512xf32, #tpu.memory_space<vmem>>, vector<1x256xf32>
    %96 = vector.broadcast %94 : f32 to vector<1x256xf32>
    %97 = arith.mulf %96, %95 : vector<1x256xf32>
    %98 = arith.addf %93, %97 : vector<1x256xf32>
    %99 = arith.mulf %98, %70 : vector<1x256xf32>
    %100 = arith.addf %84, %99 : vector<1x256xf32>
    %c0_48 = arith.constant 0 : index
    %c0_49 = arith.constant 0 : index
    %c1_50 = arith.constant 1 : index
    %101 = memref.load %arg4[%c0_48, %c0_49, %c1_50] : memref<2x3x3xf32, #tpu.memory_space<smem>>
    %c0_51 = arith.constant 0 : index
    %c112 = arith.constant 112 : index
    %102 = vector.load %arg7[%c0_51, %c112] : memref<2x512xf32, #tpu.memory_space<vmem>>, vector<1x256xf32>
    %103 = vector.broadcast %101 : f32 to vector<1x256xf32>
    %104 = arith.mulf %103, %102 : vector<1x256xf32>
    %c0_52 = arith.constant 0 : index
    %c1_53 = arith.constant 1 : index
    %c1_54 = arith.constant 1 : index
    %105 = memref.load %arg4[%c0_52, %c1_53, %c1_54] : memref<2x3x3xf32, #tpu.memory_space<smem>>
    %c0_55 = arith.constant 0 : index
    %c128_56 = arith.constant 128 : index
    %106 = vector.load %arg7[%c0_55, %c128_56] : memref<2x512xf32, #tpu.memory_space<vmem>>, vector<1x256xf32>
    %107 = vector.broadcast %105 : f32 to vector<1x256xf32>
    %108 = arith.mulf %107, %106 : vector<1x256xf32>
    %109 = arith.addf %104, %108 : vector<1x256xf32>
    %c0_57 = arith.constant 0 : index
    %c2_58 = arith.constant 2 : index
    %c1_59 = arith.constant 1 : index
    %110 = memref.load %arg4[%c0_57, %c2_58, %c1_59] : memref<2x3x3xf32, #tpu.memory_space<smem>>
    %c0_60 = arith.constant 0 : index
    %c144 = arith.constant 144 : index
    %111 = vector.load %arg7[%c0_60, %c144] : memref<2x512xf32, #tpu.memory_space<vmem>>, vector<1x256xf32>
    %112 = vector.broadcast %110 : f32 to vector<1x256xf32>
    %113 = arith.mulf %112, %111 : vector<1x256xf32>
    %114 = arith.addf %109, %113 : vector<1x256xf32>
    %115 = arith.addf %100, %114 : vector<1x256xf32>
    %c0_61 = arith.constant 0 : index
    %c0_62 = arith.constant 0 : index
    %c2_63 = arith.constant 2 : index
    %116 = memref.load %arg4[%c0_61, %c0_62, %c2_63] : memref<2x3x3xf32, #tpu.memory_space<smem>>
    %c0_64 = arith.constant 0 : index
    %c113 = arith.constant 113 : index
    %117 = vector.load %arg7[%c0_64, %c113] : memref<2x512xf32, #tpu.memory_space<vmem>>, vector<1x256xf32>
    %118 = vector.broadcast %116 : f32 to vector<1x256xf32>
    %119 = arith.mulf %118, %117 : vector<1x256xf32>
    %c0_65 = arith.constant 0 : index
    %c1_66 = arith.constant 1 : index
    %c2_67 = arith.constant 2 : index
    %120 = memref.load %arg4[%c0_65, %c1_66, %c2_67] : memref<2x3x3xf32, #tpu.memory_space<smem>>
    %c0_68 = arith.constant 0 : index
    %c129 = arith.constant 129 : index
    %121 = vector.load %arg7[%c0_68, %c129] : memref<2x512xf32, #tpu.memory_space<vmem>>, vector<1x256xf32>
    %122 = vector.broadcast %120 : f32 to vector<1x256xf32>
    %123 = arith.mulf %122, %121 : vector<1x256xf32>
    %124 = arith.addf %119, %123 : vector<1x256xf32>
    %c0_69 = arith.constant 0 : index
    %c2_70 = arith.constant 2 : index
    %c2_71 = arith.constant 2 : index
    %125 = memref.load %arg4[%c0_69, %c2_70, %c2_71] : memref<2x3x3xf32, #tpu.memory_space<smem>>
    %c0_72 = arith.constant 0 : index
    %c145 = arith.constant 145 : index
    %126 = vector.load %arg7[%c0_72, %c145] : memref<2x512xf32, #tpu.memory_space<vmem>>, vector<1x256xf32>
    %127 = vector.broadcast %125 : f32 to vector<1x256xf32>
    %128 = arith.mulf %127, %126 : vector<1x256xf32>
    %129 = arith.addf %124, %128 : vector<1x256xf32>
    %130 = arith.mulf %129, %82 : vector<1x256xf32>
    %131 = arith.addf %115, %130 : vector<1x256xf32>
    %c1_73 = arith.constant 1 : index
    %c0_74 = arith.constant 0 : index
    %c0_75 = arith.constant 0 : index
    %132 = memref.load %arg4[%c1_73, %c0_74, %c0_75] : memref<2x3x3xf32, #tpu.memory_space<smem>>
    %c1_76 = arith.constant 1 : index
    %c111_77 = arith.constant 111 : index
    %133 = vector.load %arg7[%c1_76, %c111_77] : memref<2x512xf32, #tpu.memory_space<vmem>>, vector<1x256xf32>
    %134 = vector.broadcast %132 : f32 to vector<1x256xf32>
    %135 = arith.mulf %134, %133 : vector<1x256xf32>
    %c1_78 = arith.constant 1 : index
    %c1_79 = arith.constant 1 : index
    %c0_80 = arith.constant 0 : index
    %136 = memref.load %arg4[%c1_78, %c1_79, %c0_80] : memref<2x3x3xf32, #tpu.memory_space<smem>>
    %c1_81 = arith.constant 1 : index
    %c127_82 = arith.constant 127 : index
    %137 = vector.load %arg7[%c1_81, %c127_82] : memref<2x512xf32, #tpu.memory_space<vmem>>, vector<1x256xf32>
    %138 = vector.broadcast %136 : f32 to vector<1x256xf32>
    %139 = arith.mulf %138, %137 : vector<1x256xf32>
    %140 = arith.addf %135, %139 : vector<1x256xf32>
    %c1_83 = arith.constant 1 : index
    %c2_84 = arith.constant 2 : index
    %c0_85 = arith.constant 0 : index
    %141 = memref.load %arg4[%c1_83, %c2_84, %c0_85] : memref<2x3x3xf32, #tpu.memory_space<smem>>
    %c1_86 = arith.constant 1 : index
    %c143_87 = arith.constant 143 : index
    %142 = vector.load %arg7[%c1_86, %c143_87] : memref<2x512xf32, #tpu.memory_space<vmem>>, vector<1x256xf32>
    %143 = vector.broadcast %141 : f32 to vector<1x256xf32>
    %144 = arith.mulf %143, %142 : vector<1x256xf32>
    %145 = arith.addf %140, %144 : vector<1x256xf32>
    %146 = arith.mulf %145, %70 : vector<1x256xf32>
    %147 = arith.addf %131, %146 : vector<1x256xf32>
    %c1_88 = arith.constant 1 : index
    %c0_89 = arith.constant 0 : index
    %c1_90 = arith.constant 1 : index
    %148 = memref.load %arg4[%c1_88, %c0_89, %c1_90] : memref<2x3x3xf32, #tpu.memory_space<smem>>
    %c1_91 = arith.constant 1 : index
    %c112_92 = arith.constant 112 : index
    %149 = vector.load %arg7[%c1_91, %c112_92] : memref<2x512xf32, #tpu.memory_space<vmem>>, vector<1x256xf32>
    %150 = vector.broadcast %148 : f32 to vector<1x256xf32>
    %151 = arith.mulf %150, %149 : vector<1x256xf32>
    %c1_93 = arith.constant 1 : index
    %c1_94 = arith.constant 1 : index
    %c1_95 = arith.constant 1 : index
    %152 = memref.load %arg4[%c1_93, %c1_94, %c1_95] : memref<2x3x3xf32, #tpu.memory_space<smem>>
    %c1_96 = arith.constant 1 : index
    %c128_97 = arith.constant 128 : index
    %153 = vector.load %arg7[%c1_96, %c128_97] : memref<2x512xf32, #tpu.memory_space<vmem>>, vector<1x256xf32>
    %154 = vector.broadcast %152 : f32 to vector<1x256xf32>
    %155 = arith.mulf %154, %153 : vector<1x256xf32>
    %156 = arith.addf %151, %155 : vector<1x256xf32>
    %c1_98 = arith.constant 1 : index
    %c2_99 = arith.constant 2 : index
    %c1_100 = arith.constant 1 : index
    %157 = memref.load %arg4[%c1_98, %c2_99, %c1_100] : memref<2x3x3xf32, #tpu.memory_space<smem>>
    %c1_101 = arith.constant 1 : index
    %c144_102 = arith.constant 144 : index
    %158 = vector.load %arg7[%c1_101, %c144_102] : memref<2x512xf32, #tpu.memory_space<vmem>>, vector<1x256xf32>
    %159 = vector.broadcast %157 : f32 to vector<1x256xf32>
    %160 = arith.mulf %159, %158 : vector<1x256xf32>
    %161 = arith.addf %156, %160 : vector<1x256xf32>
    %162 = arith.addf %147, %161 : vector<1x256xf32>
    %c1_103 = arith.constant 1 : index
    %c0_104 = arith.constant 0 : index
    %c2_105 = arith.constant 2 : index
    %163 = memref.load %arg4[%c1_103, %c0_104, %c2_105] : memref<2x3x3xf32, #tpu.memory_space<smem>>
    %c1_106 = arith.constant 1 : index
    %c113_107 = arith.constant 113 : index
    %164 = vector.load %arg7[%c1_106, %c113_107] : memref<2x512xf32, #tpu.memory_space<vmem>>, vector<1x256xf32>
    %165 = vector.broadcast %163 : f32 to vector<1x256xf32>
    %166 = arith.mulf %165, %164 : vector<1x256xf32>
    %c1_108 = arith.constant 1 : index
    %c1_109 = arith.constant 1 : index
    %c2_110 = arith.constant 2 : index
    %167 = memref.load %arg4[%c1_108, %c1_109, %c2_110] : memref<2x3x3xf32, #tpu.memory_space<smem>>
    %c1_111 = arith.constant 1 : index
    %c129_112 = arith.constant 129 : index
    %168 = vector.load %arg7[%c1_111, %c129_112] : memref<2x512xf32, #tpu.memory_space<vmem>>, vector<1x256xf32>
    %169 = vector.broadcast %167 : f32 to vector<1x256xf32>
    %170 = arith.mulf %169, %168 : vector<1x256xf32>
    %171 = arith.addf %166, %170 : vector<1x256xf32>
    %c1_113 = arith.constant 1 : index
    %c2_114 = arith.constant 2 : index
    %c2_115 = arith.constant 2 : index
    %172 = memref.load %arg4[%c1_113, %c2_114, %c2_115] : memref<2x3x3xf32, #tpu.memory_space<smem>>
    %c1_116 = arith.constant 1 : index
    %c145_117 = arith.constant 145 : index
    %173 = vector.load %arg7[%c1_116, %c145_117] : memref<2x512xf32, #tpu.memory_space<vmem>>, vector<1x256xf32>
    %174 = vector.broadcast %172 : f32 to vector<1x256xf32>
    %175 = arith.mulf %174, %173 : vector<1x256xf32>
    %176 = arith.addf %171, %175 : vector<1x256xf32>
    %177 = arith.mulf %176, %82 : vector<1x256xf32>
    %178 = arith.addf %162, %177 : vector<1x256xf32>
    %179 = arith.negf %178 : vector<1x256xf32>
    %180 = math.exp %179 : vector<1x256xf32>
    %cst_118 = arith.constant 1.000000e+00 : f32
    %181 = vector.broadcast %cst_118 : f32 to vector<1x256xf32>
    %182 = arith.addf %181, %180 : vector<1x256xf32>
    %183 = arith.divf %181, %182 : vector<1x256xf32>
    %184 = vector.broadcast %183 : vector<1x256xf32> to vector<4x256xf32>
    %185 = arith.mulf %31, %184 : vector<4x256xf32>
    %c0_119 = arith.constant 0 : index
    %c0_120 = arith.constant 0 : index
    %c0_121 = arith.constant 0 : index
    %186 = vector.load %arg6[%c0_119, %c0_120, %c0_121] : memref<1x4x256xf32, #tpu.memory_space<vmem>>, vector<1x4x256xf32>
    %187 = vector.shape_cast %186 : vector<1x4x256xf32> to vector<4x256xf32>
    %188 = vector.shape_cast %185 : vector<4x256xf32> to vector<1x4x256xf32>
    tpu.vector_store %arg6[%c0_119, %c0_120, %c0_121], %188 {strides = array<i32>} : memref<1x4x256xf32, #tpu.memory_space<vmem>>, vector<1x4x256xf32>,
    return
  }
  func.func @transform_0(%arg0: i32) -> (i32, i32, i32) {
    %c0_i32 = arith.constant 0 : i32
    %c0_i32_0 = arith.constant 0 : i32
    %c0_i32_1 = arith.constant 0 : i32
    return %arg0, %c0_i32, %c0_i32_0 : i32, i32, i32
  }
  func.func @transform_1(%arg0: i32) -> (i32, i32) {
    %c0_i32 = arith.constant 0 : i32
    %c0_i32_0 = arith.constant 0 : i32
    %c0_i32_1 = arith.constant 0 : i32
    return %c0_i32, %c0_i32_0 : i32, i32
  }
  func.func @transform_2(%arg0: i32) -> (i32, i32) {
    %c0_i32 = arith.constant 0 : i32
    %c0_i32_0 = arith.constant 0 : i32
    %c0_i32_1 = arith.constant 0 : i32
    return %c0_i32, %c0_i32_0 : i32, i32
  }
  func.func @transform_3(%arg0: i32) -> (i32, i32, i32) {
    %c0_i32 = arith.constant 0 : i32
    %c0_i32_0 = arith.constant 0 : i32
    %c0_i32_1 = arith.constant 0 : i32
    %c0_i32_2 = arith.constant 0 : i32
    return %c0_i32, %c0_i32_0, %c0_i32_1 : i32, i32, i32
  }
  func.func @transform_4(%arg0: i32) -> i32 {
    %c0_i32 = arith.constant 0 : i32
    %c0_i32_0 = arith.constant 0 : i32
    return %c0_i32 : i32
  }
  func.func @transform_5(%arg0: i32) -> (i32, i32, i32) {
    %c0_i32 = arith.constant 0 : i32
    %c0_i32_0 = arith.constant 0 : i32
    %c0_i32_1 = arith.constant 0 : i32
    return %arg0, %c0_i32, %c0_i32_0 : i32, i32, i32
  }
}

</mosaic_0001>

<bundles_post_ra>
// kernel: tpu_custom_call.1
= control target key start
LH: loop header
LB: loop body
LE: loop exit
PB: predicated region body
PF: predicated region fallthrough
CT: control target
= control target key end

     0   :  { %s1247_s0 = inlined_call_operand.vmem [shape: f32[2,4,256], index: 0, kind: input, shape index: {}]   ;;  %s1248_s1 = inlined_call_operand.vmem [shape: f32[4,1], index: 1, kind: input, shape index: {}]   ;;  %s1249_s2 = inlined_call_operand.vmem [shape: f32[4,1], index: 2, kind: input, shape index: {}]   ;;  %s1250_s3 = inlined_call_operand.vmem [shape: f32[2,3,3], index: 3, kind: input, shape index: {}]   ;;  %s1251_s4 = inlined_call_operand.<no memory space> [shape: f32[1], index: 4, kind: input, shape index: {}]   ;;  %s1252_s5 = inlined_call_operand.hbm [shape: f32[2,4,256], index: 5, kind: output, shape index: {}]  }
   0x1   :  { %10 = sst [smem:[#allocation3]] %s1251_s4 }
   0x2   :  { %11 = vsyncpa [#allocation6], 0 }
   0x3   :  { %12 = vsyncpa [#allocation5], 0 }
   0x4   :  { %14 = vsyncpa [#allocation5 + $0x1], 0  ;;  %s1019_s20 = smov 0   ;;  %s1021_s21 = smov 0  }
   0x5   :  { %s1023_s22 = smov 0   ;;  %s1025_s23 = smov 0  }
   0x6 LB: > { %s1040_s4 = sadd.s32 4294967295, %s969_s23   ;;  %s779_s24 = sadd.s32 4294967294, %s969_s23   ;;  %s969_s23 = sphi %s1025_s23, %s1260_s23   ;;  %s965_s22 = sphi %s1023_s22, %s1259_s22   ;;  %s961_s21 = sphi %s1021_s21, %s1258_s21   ;;  %s957_s20 = sphi %s1019_s20, %s1257_s20  }
   0x7   : > { %s1044_s25 = sadd.s32 1, %s969_s23   ;;  %s137_s26 = sadd.s32 1, %s965_s22 }
   0x8   : > { %s134_s27 = ssub.s32 %s969_s23, %s1044_s25  ;;  %p147_p0 = scmp.ne.s32.totalorder %s965_s22, %s961_s21 }
   0x9   : > { %p135_p1 = scmp.eq.s32.totalorder %s134_s27, 0  ;;  %p148_p2 = scmp.eq.s32.totalorder %s1040_s4, 1 }
   0xa   : > { %p153_p3 = scmp.ne.s32.totalorder %s961_s21, %s957_s20  ;;  %p154_p4 = scmp.eq.s32.totalorder %s779_s24, 1 }
   0xb   : > { %s1055_s28 = scalar_select %p135_p1, %s965_s22, %s137_s26  }
   0xc   : > { %p1057_p5 = por %p148_p2, %p147_p0  ;;  %p1061_p6 = por %p154_p4, %p153_p3 }
   0xd   : > { %p780_p7 = scmp.ge.s32.totalorder %s969_s23, 1  ;;  %p161_p8 = scmp.lt.s32.totalorder %s969_s23, 3 }
   0xe   : > { %p828_p9 = scmp.eq.s32.totalorder %s1040_s4, 0  ;;  %s179_s9 = sshll.u32 %s1250_s3, 4  ;;  %s180_s9 = int_to_ptr.vmem [resolvable:$true] %s179_s9 }
   0xf   : > { %p1068_p10 = pnand %p780_p7, %p161_p8  ;;  %s888_s11 = scalar_lea.vmem %s180_s9, 128 }
  0x10   : > { %p889_p13 = scmp.ne.s32.totalorder %s180_s9, %s888_s11  ;;  %p896_p3 = scmp.lt.s32.totalorder %s180_s9, %s180_s9 }
  0x11   : > { %p820_p11 = pneg %p1068_p10  ;;  %p897_p4 = scmp.lt.s32.totalorder %s888_s11, %s888_s11 }
  0x13   : > { %p1079_p12 = pnand %p828_p9, %p820_p11  ;;  %p898_p7 = por %p897_p4, %p896_p3 }
  0x15   : > { %p890_p0 = pneg %p1079_p12 }
  0x17   : > { %p891_p1 = pnand %p890_p0, %p889_p13 }
  0x19   : > { %p892_p2 = pneg %p891_p1 }
  0x1b   : > { %p899_p8 = pnand %p898_p7, %p892_p2 }
  0x1d   : > { %902 = shalt.err (!%p899_p8)
}
  0x1e   : > { %s971_s12 = smov [#allocation4]   ;;  %s972_s13 = smov 64  }
  0x1f   : > { %s973_s14 = smov 4   ;;  %206 = sbr.rel (%p1068_p10) target bundleno = 841 (0x349), region = 40 }
  0x20   : > { %823 = dma.vmem_to_smem (!%p1079_p12), %s180_s9, 128, %s971_s12, [#allocation6], %s972_s13, %s972_s13, %s973_s14  }
  0x26   : > { %948 = dma.done.wait (%p828_p9), [#allocation6], 128  }
  0x27   : > { %950 = vsyncadd (%p828_p9), [#allocation6], 4294967168 }
  0x28   : > { %212 = sfence }
  0x29   : > { %p235_p11 = scmp.lt.s32.totalorder %s1040_s4, 1  ;;  %vm244_vm0 = vcmask 1043456   ;;  %v974_v8 = vmov 0   ;;  %v975_v9 = vmov 0.0   ;;  %v256_v11 = vld [vmem:[%s1248_s1] sm:$0xf]  ;;  %v293_v41 = vlaneseq }
  0x2a   : > { %877 = vset.pattern.permute.xlu1 %v974_v8  ;;  %878 = vset.pattern.permute.xlu0 %v974_v8  ;;  %299 = vst [vmem:[#allocation2] sm:$0xff] %v975_v9  ;;  %vm259_vm1 = vcmask 3072   ;;  %v257_v32 = vld [vmem:[%s1249_s2] sm:$0xf]  ;;  %v976_v39 = vmov 839922192  }
  0x2b   : > { %s236_s15 = scalar_select %p235_p11, %s1040_s4, 1  ;;  %v291_v40 = vunpack.c.l.s4 %v976_v39  ;;  %v1109_v43 = vshrl.u32 %v293_v41, 7  ;;  %v1120_v51 = vand.u32 127, %v293_v41  ;;  %v977_v60 = vmov 1966171168  }
  0x2c   : > { %v321_v61 = vunpack.c.l.s4 %v977_v60  ;;  %vm337_vm4 = vcmp.lt.s32.totalorder %v293_v41, 256  ;;  %s795_s7 = sld [smem:[#allocation4 + $0x82]]  ;;  %s792_s8 = sld [smem:[#allocation4 + $0x81]]  ;;  %vm437_vm7 = vcmask 916480   ;;  %vm450_vm8 = vcmask 785408  }
  0x2d   : > { %s812_s16 = sshll.u32 %s236_s15, 3  ;;  %v292_v42 = vunpack.c.0.s8 %v291_v40  ;;  %v1125_v62 = vadd.s32 128, %v1120_v51  ;;  %v384_v8 = vand.u32 15, %v1120_v51  ;;  %s805_s9 = sld [smem:[#allocation4 + $0x302]]  ;;  %vm556_vm9 = vcmask 924672  }
  0x2e   : > { %s239_s19 = scalar_lea.vmem %s1247_s0, %s812_s16  ;;  %s793_s10 = sld [smem:[#allocation4 + $0x101]]  ;;  %vm474_vm10 = vcmask 908288   ;;  %vm509_vm11 = vcmask 1039360   ;;  %vm564_vm12 = vcmask 1031168   ;;  %vm688_vm13 = vcmask 138240  }
  0x2f   : > { %v240_v0 = vld [vmem:[%s239_s19] sm:$0xff]  ;;  %v295_v44 = vsub.s32 %v292_v42, %v1109_v43  ;;  %s790_s11 = sld [smem:[#allocation4 + $0x100]]  ;;  %s796_s12 = sld [smem:[#allocation4 + $0x102]] }
  0x30   : > { %v242_v1 = vcombine.high %v240_v0, %v240_v0  ;;  %v250_v2 = vsel %vm244_vm0, %v240_v0, 0.0  ;;  %v245_v4 = vsel %vm244_vm0, %v240_v0, -inf  ;;  %s798_s13 = sld [smem:[#allocation4 + $0x280]]  ;;  %s978_s14 = smov 112  }
  0x31   : > { %s801_s15 = sld [smem:[#allocation4 + $0x281]]  ;;  %s799_s16 = sld [smem:[#allocation4 + $0x300]] }
  0x32   : > { %v251_v3 = vsel %vm244_vm0, %v242_v1, 0.0  ;;  %v246_v5 = vsel %vm244_vm0, %v242_v1, -inf  ;;  %s979_s17 = smov 96   ;;  %s980_s18 = smov 113  }
  0x33   : > { %v252_v6 = vadd.f32 %v251_v3, %v250_v2  ;;  %v247_v7 = vmax.f32 %v245_v4, %v246_v5  ;;  %s804_s19 = sld [smem:[#allocation4 + $0x282]]  ;;  %s802_s24 = sld [smem:[#allocation4 + $0x301]] }
  0x34   : > { %s789_s26 = sld [smem:[#allocation4 + $0x80]]  ;;  %s981_s27 = smov 111  }
  0x35   : > { %253 = vadd.xlane.f32.xlu0 %v252_v6  ;;  %s791_s6 = sld [smem:[#allocation4 + $0x1]] }
  0x39   : > { %248 = vmax.xlane.f32.xlu0 %v247_v7  ;;  %v322_v7 = vunpack.c.0.s8 %v321_v61 }
  0xc2   : > { %v254_v10 = vpop.xlane.xlu0 %253 }
  0xc3   : > { %v255_v12 = vmul.f32 0.00390625, %v254_v10  ;;  %v391_v10 = vand.u32 15, %v1125_v62 }
  0xc5   : > { %v268_v13 = vmul.f32 %v256_v11, %v255_v12  ;;  %v405_v60 = vadd.s32 4294967295, %v391_v10 }
  0xc6   : > { %v249_v14 = vpop.xlane.xlu0 %248 }
  0xc7   : > { %v269_v15 = vsel %vm259_vm1, %v268_v13, 0.0  ;;  %v258_v16 = vmul.f32 %v256_v11, %v249_v14  ;;  %vm407_vm6 = vcmp.ge.s32.totalorder %v405_v60, 0 }
  0xc8   : > { %v270_v17 = vrot.slane %v269_v15, 4  ;;  %v413_v62 = vsel %vm407_vm6, 1.0, %v975_v9 }
  0xc9   : > { %v260_v18 = vsel %vm259_vm1, %v258_v16, 0.0 }
  0xca   : > { %v271_v19 = vadd.f32 %v270_v17, %v269_v15  ;;  %v261_v20 = vrot.slane %v260_v18, 4 }
  0xcc   : > { %v272_v21 = vrot.slane %v271_v19, 2  ;;  %v262_v22 = vadd.f32 %v261_v20, %v260_v18  ;;  %v1130_v18 = vsub.s32 %v322_v7, %v1109_v43 }
  0xce   : > { %v273_v23 = vadd.f32 %v272_v21, %v271_v19  ;;  %v263_v24 = vrot.slane %v262_v22, 2  ;;  %v414_v19 = vadd.s32 1, %v384_v8 }
  0xd0   : > { %v274_v25 = vrot.slane %v273_v23, 1  ;;  %v264_v26 = vadd.f32 %v263_v24, %v262_v22  ;;  %vm418_vm2 = vcmp.lt.s32.totalorder %v414_v19, 16 }
  0xd2   : > { %v275_v27 = vadd.f32 %v274_v25, %v273_v23  ;;  %v265_v28 = vrot.slane %v264_v26, 1  ;;  %v415_v23 = vadd.s32 1, %v391_v10 }
  0xd4   : > { %v266_v29 = vadd.f32 %v265_v28, %v264_v26  ;;  %v276_v30 = vmax.f32 %v275_v27, 0.0  ;;  %vm419_vm3 = vcmp.lt.s32.totalorder %v415_v23, 16 }
  0xd6   : > { %v267_v31 = vmax.f32 %v266_v29, 0.0 }
  0xd8   : > { %v277_v33 = vadd.f32 %v276_v30, %v267_v31  ;;  %v422_v31 = vsel %vm418_vm2, 1.0, %v975_v9 }
  0xda   : > { %v278_v34 = vmul.f32 %v277_v33, %v257_v32  ;;  %v423_v32 = vsel %vm419_vm3, 1.0, %v975_v9 }
  0xdc   : > { %v788_v35 = vmul.f32 -1.442695, %v278_v34  ;;  %v538_v34 = vcombine.low %v422_v31, %v423_v32 }
  0xde   : > { %880 = vpow2.f32 %v788_v35  ;;  %v517_v35 = vstv %s795_s7  ;;  %s794_s7 = sld [smem:[#allocation4 + $0x2]] }
  0xe8   : > { %v881_v36 = vpop.eup %880 }
  0xe9   : > { %v283_v37 = vadd.f32 1.0, %v881_v36  ;;  %v485_v36 = vstv %s792_s8  ;;  %s797_s8 = sld [smem:[#allocation4 + $0x200]] }
  0xeb   : > { %882 = vrcp.f32 %v283_v37  ;;  %v545_v37 = vrot.slane %v538_v34, %v1130_v18 }
  0xef   : > { %v571_v31 = vstv %s797_s8  ;;  %s985_s8 = smov [#allocation7]  }
  0xf5   : > { %v883_v38 = vpop.eup %882 }
  0xf6   : > { %288 = vperm.xlu1 %877, %v883_v38  }
 0x175   : > { %v289_v45 = vpop.permute.xlu1 %288 }
 0x176   : > { %v296_v46 = vrot.slane %v289_v45, %v295_v44  ;;  %v644_v44 = vstv %s805_s9  ;;  %v552_v45 = vrot.slane %v545_v37, %v1130_v18  ;;  %s1175_s9 = sld [smem:[#allocation4 + $0x202]] }
 0x178   : > { %v1112_v47 = vmul.f32 %v296_v46, %v240_v0 }
 0x17a   : > { %v301_v48 = vcombine.high %v1112_v47, %v1112_v47  ;;  %v303_v49 = vsel %vm244_vm0, %v1112_v47, -inf  ;;  %v341_v50 = vsel %vm244_vm0, %v1112_v47, 0.0 }
 0x17b   : > { %v304_v52 = vrot.slane %v303_v49, 4  ;;  %v342_v53 = vrot.slane %v341_v50, 4 }
 0x17c   : > { %v310_v54 = vsel %vm244_vm0, %v301_v48, -inf  ;;  %v348_v55 = vsel %vm244_vm0, %v301_v48, 0.0  ;;  %v496_v48 = vstv %s793_s10  ;;  %s800_s10 = sld [smem:[#allocation4 + $0x201]] }
 0x17d   : > { %v305_v56 = vmax.f32 %v303_v49, %v304_v52  ;;  %v311_v57 = vrot.slane %v310_v54, 4  ;;  %v343_v58 = vadd.f32 %v342_v53, %v341_v50  ;;  %v349_v59 = vrot.slane %v348_v55, 4 }
 0x17e   : > { %v444_v50 = vstv %s790_s11  ;;  %s982_s11 = smov 127  }
 0x17f   : > { %v306_v63 = vrot.slane %v305_v56, 2  ;;  %v312_v0 = vmax.f32 %v310_v54, %v311_v57  ;;  %v344_v1 = vrot.slane %v343_v58, 2  ;;  %v350_v2 = vadd.f32 %v349_v59, %v348_v55 }
 0x180   : > { %v527_v54 = vstv %s796_s12  ;;  %v404_v59 = vadd.s32 4294967295, %v384_v8  ;;  %s426_s12 = sld [smem:[#allocation4]] }
 0x181   : > { %v307_v3 = vmax.f32 %v305_v56, %v306_v63  ;;  %v313_v4 = vrot.slane %v312_v0, 2  ;;  %v345_v5 = vadd.f32 %v344_v1, %v343_v58  ;;  %v351_v6 = vrot.slane %v350_v2, 2 }
 0x182   : > { %v574_v56 = vstv %s798_s13  ;;  %v603_v63 = vstv %s801_s15  ;;  %v586_v1 = vstv %s799_s16  ;;  %vm406_vm5 = vcmp.ge.s32.totalorder %v404_v59, 0  ;;  %s983_s13 = smov 126   ;;  %s984_s15 = smov 17  }
 0x183   : > { %v308_v11 = vrot.slane %v307_v3, 1  ;;  %v314_v12 = vmax.f32 %v312_v0, %v313_v4  ;;  %v346_v13 = vrot.slane %v345_v5, 1  ;;  %v352_v14 = vadd.f32 %v351_v6, %v350_v2  ;;  %s232_s16 = sand.u32 1, %s961_s21  }
 0x184   : > { %v634_v4 = vstv %s804_s19  ;;  %v412_v51 = vsel %vm406_vm5, 1.0, %v975_v9  ;;  %v614_v6 = vstv %s802_s24  ;;  %v599_v60 = vstv %s800_s10 }
 0x185   : > { %v315_v15 = vrot.slane %v314_v12, 1  ;;  %v347_v16 = vadd.f32 %v346_v13, %v345_v5  ;;  %v353_v17 = vrot.slane %v352_v14, 1  ;;  %v309_v20 = vmax.f32 %v307_v3, %v308_v11 }
 0x186   : > { %v456_v7 = vcombine.low %v412_v51, %v413_v62  ;;  %v431_v11 = vstv %s789_s26 }
 0x187   : > { %v316_v21 = vmax.f32 %v314_v12, %v315_v15  ;;  %v354_v22 = vadd.f32 %v353_v17, %v352_v14  ;;  %v355_v25 = vmul.f32 0.25, %v347_v16 }
 0x188   : > { %v463_v12 = vrot.slane %v456_v7, %v1130_v18 }
 0x189   : > { %v319_v24 = vcombine.low %v309_v20, %v316_v21  ;;  %v356_v26 = vmul.f32 0.25, %v354_v22  ;;  %v481_v21 = vstv %s791_s6 }
 0x18a   : > { %v470_v14 = vrot.slane %v463_v12, %v1130_v18 }
 0x18b   : > { %v326_v27 = vrot.slane %v319_v24, %v1130_v18  ;;  %v359_v28 = vcombine.low %v355_v25, %v356_v26 }
 0x18d   : > { %v333_v29 = vrot.slane %v326_v27, %v1130_v18  ;;  %v366_v30 = vrot.slane %v359_v28, %v1130_v18 }
 0x18f   : > { %340 = vst.msk [vmem:[#allocation2 + $0x2] ss:$2 sm:$0x3] %vm337_vm4, %v333_v29  ;;  %v373_v33 = vrot.slane %v366_v30, %v1130_v18  ;;  %v514_v18 = vstv %s794_s7  ;;  %s694_s7 = scalar_lea.sflag [#allocation5], %s232_s16 }
 0x191   : > { %376 = vst.msk [vmem:[#allocation2 + $0x3] ss:$2 sm:$0x3] %vm337_vm4, %v373_v33 }
 0x196   : > { %v495_v38 = vld [vmem:[#allocation2 + $0x2] ss:$2 sm:$0x7] }
 0x197   : > { %v484_v39 = vld [vmem:[#allocation2 + $0x2] ss:$2 sm:$0x3]  ;;  %v518_v40 = vmul.f32 %v517_v35, %v495_v38  ;;  %v497_v52 = vmul.f32 %v496_v48, %v495_v38  ;;  %v528_v57 = vmul.f32 %v527_v54, %v495_v38 }
 0x198   : > { %v486_v41 = vmul.f32 %v485_v36, %v484_v39  ;;  %v613_v42 = vld [vmem:[#allocation2 + $0x3] ss:$2 sm:$0x7]  ;;  %v443_v49 = vld [vmem:[#allocation2 + $0x2] ss:$2 sm:$0x7] }
 0x199   : > { %520 = vrot.lane.b32.xlu0 %v518_v40, %s978_s14  ;;  %v645_v46 = vmul.f32 %v644_v44, %v613_v42  ;;  %v445_v53 = vmul.f32 %v444_v50, %v443_v49  ;;  %v1147_v55 = vld [vmem:[#allocation2 + $0x1] ss:$2 sm:$0x7]  ;;  %v635_v5 = vmul.f32 %v634_v4, %v613_v42  ;;  %v615_v8 = vmul.f32 %v614_v6, %v613_v42  ;;  %v1163_v10 = vld [vmem:[#allocation2] ss:$2 sm:$0x7] }
 0x19a   : > { %488 = vrot.lane.b32.xlu1 %v486_v41, %s978_s14  ;;  %v575_v58 = vmul.f32 %v574_v56, %v1147_v55  ;;  %v602_v61 = vld [vmem:[#allocation2 + $0x3] ss:$2 sm:$0x3]  ;;  %v432_v13 = vmul.f32 %v431_v11, %v1163_v10  ;;  %v480_v20 = vld [vmem:[#allocation2] ss:$2 sm:$0x7]  ;;  %v572_v40 = vmul.f32 %v571_v31, %v1147_v55 }
 0x19b   : > { %v585_v0 = vld [vmem:[#allocation2 + $0x3] ss:$2 sm:$0x7]  ;;  %v604_v2 = vmul.f32 %v603_v63, %v602_v61  ;;  %v482_v24 = vmul.f32 %v481_v21, %v480_v20  ;;  %v515_v32 = vmul.f32 %v514_v18, %v480_v20 }
 0x19c   : > { %v587_v3 = vmul.f32 %v586_v1, %v585_v0 }
 0x19d   : > { %647 = vrot.lane.b32.xlu0 %v645_v46, %s979_s17 }
 0x19e   : > { %553 = vrot.lane.b32.xlu1 %v552_v45, %s980_s18  ;;  %s813_s18 = sshll.u32 %s1040_s4, 7 }
 0x19f   : > { %s1205_s6 = scalar_lea.hbm %s1252_s5, %s813_s18 }
 0x1a1   : > { %447 = vrot.lane.b32.xlu0 %v445_v53, %s979_s17  ;;  %v598_v53 = vld [vmem:[#allocation2 + $0x1] ss:$2 sm:$0x7] }
 0x1a2   : > { %499 = vrot.lane.b32.xlu1 %v497_v52, %s979_s17 }
 0x1a5   : > { %577 = vrot.lane.b32.xlu0 %v575_v58, %s978_s14 }
 0x1a6   : > { %530 = vrot.lane.b32.xlu1 %v528_v57, %s979_s17  ;;  %v631_v57 = vstv %s1175_s9  ;;  %s907_s9 = sshll.u32 %s985_s8, 4  ;;  %s908_s9 = int_to_ptr.vmem [resolvable:$false] %s907_s9 }
 0x1a7   : > { %v632_v63 = vmul.f32 %v631_v57, %v598_v53  ;;  %s909_s10 = scalar_lea.vmem %s908_s9, 256 }
 0x1a9   : > { %589 = vrot.lane.b32.xlu0 %v587_v3, %s979_s17 }
 0x1aa   : > { %606 = vrot.lane.b32.xlu1 %v604_v2, %s978_s14  ;;  %v600_v2 = vmul.f32 %v599_v60, %v598_v53 }
 0x1ae   : > { %637 = vrot.lane.b32.xlu1 %v635_v5, %s978_s14 }
 0x1b2   : > { %617 = vrot.lane.b32.xlu1 %v615_v8, %s979_s17  ;;  %v428_v8 = vstv %s426_s12  ;;  %s785_s17 = sshll.u32 %s232_s16, 3 }
 0x1b3   : > { %s234_s19 = scalar_lea.vmem [#allocation7], %s785_s17 }
 0x1b4   : > { %s708_s24 = sshll.u32 %s234_s19, 4  ;;  %s1207_s24 = int_to_ptr.vmem [resolvable:$true] %s708_s24 }
 0x1b5   : > { %s903_s4 = scalar_lea.vmem %s1207_s24, 128  ;;  %p910_p13 = scmp.lt.s32.totalorder %s1207_s24, %s908_s9 }
 0x1b6   : > { %434 = vrot.lane.b32.xlu1 %v432_v13, %s978_s14  ;;  %s424_s14 = sld [smem:[#allocation3]]  ;;  %p904_p9 = scmp.ne.s32.totalorder %s1207_s24, %s903_s4 }
 0x1b7   : > { %p911_p0 = scmp.lt.s32.totalorder %s909_s10, %s903_s4 }
 0x1b8   : > { %p905_p10 = pnand %p904_p9, %p1057_p5 }
 0x1b9   : > { %p912_p1 = por %p911_p0, %p910_p13 }
 0x1ba   : > { %471 = vrot.lane.b32.xlu1 %v470_v14, %s981_s27  ;;  %p906_p12 = pneg %p905_p10 }
 0x1bc   : > { %p913_p2 = pnand %p912_p1, %p906_p12 }
 0x20b   : > { %v521_v9 = vpop.permute.xlu0 %520 }
 0x20c   : > { %v489_v15 = vpop.permute.xlu1 %488  ;;  %v522_v22 = vrot.slane %v521_v9, 7 }
 0x20d   : > { %v490_v16 = vrot.slane %v489_v15, 7 }
 0x20e   : > { %v523_v29 = vsel %vm437_vm7, %v522_v22, %v521_v9 }
 0x20f   : > { %v648_v17 = vpop.permute.xlu0 %647  ;;  %v491_v23 = vsel %vm437_vm7, %v490_v16, %v489_v15  ;;  %v525_v39 = vadd.f32 %v523_v29, %v515_v32  ;;  %v429_v15 = vmul.f32 %v428_v8, %v1163_v10  ;;  %v425_v10 = vstv %s424_s14 }
 0x210   : > { %v554_v19 = vpop.permute.xlu1 %553  ;;  %v493_v28 = vadd.f32 %v491_v23, %v482_v24  ;;  %v649_v59 = vrot.slane %v648_v17, 7 }
 0x211   : > { %v555_v36 = vrot.slane %v554_v19, 7 }
 0x212   : > { %v650_v51 = vsel %vm450_vm8, %v649_v59, %v648_v17 }
 0x213   : > { %v1171_v26 = vpop.permute.xlu0 %447  ;;  %v557_v49 = vsel %vm556_vm9, %v555_v36, %v554_v19 }
 0x214   : > { %v500_v25 = vpop.permute.xlu1 %499  ;;  %v449_v14 = vrot.slane %v1171_v26, 7 }
 0x215   : > { %v501_v27 = vrot.slane %v500_v25, 7 }
 0x216   : > { %v451_v19 = vsel %vm450_vm8, %v449_v14, %v1171_v26 }
 0x217   : > { %v502_v30 = vsel %vm450_vm8, %v501_v27, %v500_v25  ;;  %v578_v35 = vpop.permute.xlu0 %577 }
 0x218   : > { %v504_v33 = vadd.f32 %v502_v30, %v493_v28  ;;  %v531_v34 = vpop.permute.xlu1 %530  ;;  %v579_v38 = vrot.slane %v578_v35, 1 }
 0x219   : > { %v532_v37 = vrot.slane %v531_v34, 7 }
 0x21a   : > { %506 = vrot.lane.b32.xlu1 %v504_v33, %s982_s11  ;;  %v580_v42 = vsel %vm437_vm7, %v578_v35, %v579_v38 }
 0x21b   : > { %v533_v41 = vsel %vm450_vm8, %v532_v37, %v531_v34  ;;  %v582_v45 = vadd.f32 %v580_v42, %v572_v40  ;;  %v590_v48 = vpop.permute.xlu0 %589 }
 0x21c   : > { %v535_v44 = vadd.f32 %v533_v41, %v525_v39  ;;  %v607_v46 = vpop.permute.xlu1 %606  ;;  %v591_v50 = vrot.slane %v590_v48, 7 }
 0x21d   : > { %v608_v54 = vrot.slane %v607_v46, 7 }
 0x21e   : > { %v559_v52 = vmul.f32 %v557_v49, %v535_v44  ;;  %v592_v56 = vsel %vm450_vm8, %v591_v50, %v590_v48  ;;  %v678_v48 = vsub.s32 2, %v1109_v43  ;;  %v674_v50 = vsub.s32 1, %v1109_v43 }
 0x21f   : > { %v594_v55 = vadd.f32 %v592_v56, %v582_v45  ;;  %v609_v0 = vsel %vm437_vm7, %v608_v54, %v607_v46 }
 0x220   : > { %v638_v58 = vpop.permute.xlu1 %637  ;;  %561 = vrot.lane.b32.xlu1 %v559_v52, %s983_s13  ;;  %v611_v5 = vadd.f32 %v609_v0, %v600_v2 }
 0x221   : > { %v639_v61 = vrot.slane %v638_v58, 7 }
 0x223   : > { %v640_v1 = vsel %vm437_vm7, %v639_v61, %v638_v58 }
 0x224   : > { %v642_v3 = vadd.f32 %v640_v1, %v632_v63  ;;  %v618_v4 = vpop.permute.xlu1 %617 }
 0x225   : > { %v619_v62 = vrot.slane %v618_v4, 7 }
 0x226   : > { %v652_v6 = vadd.f32 %v650_v51, %v642_v3 }
 0x227   : > { %v620_v7 = vsel %vm450_vm8, %v619_v62, %v618_v4 }
 0x228   : > { %v622_v11 = vadd.f32 %v620_v7, %v611_v5  ;;  %v435_v12 = vpop.permute.xlu1 %434  ;;  %v653_v13 = vmul.f32 %v652_v6, %v557_v49  ;;  %v670_v49 = vsub.s32 0, %v1109_v43 }
 0x229   : > { %v436_v9 = vrot.slane %v435_v12, 1 }
 0x22a   : > { %624 = vrot.lane.b32.xlu0 %v622_v11, %s982_s11  ;;  %655 = vrot.lane.b32.xlu1 %v653_v13, %s983_s13 }
 0x22b   : > { %v438_v16 = vsel %vm437_vm7, %v435_v12, %v436_v9 }
 0x22c   : > { %v440_v17 = vadd.f32 %v438_v16, %v429_v15  ;;  %v472_v21 = vpop.permute.xlu1 %471 }
 0x22d   : > { %v473_v22 = vrot.slane %v472_v21, 7 }
 0x22e   : > { %v453_v20 = vadd.f32 %v451_v19, %v440_v17 }
 0x22f   : > { %v475_v23 = vsel %vm474_vm10, %v473_v22, %v472_v21 }
 0x230   : > { %v477_v18 = vmul.f32 %v475_v23, %v453_v20  ;;  %v595_v26 = vmul.f32 %v594_v55, %v475_v23 }
 0x232   : > { %v478_v28 = vadd.f32 %v477_v18, %v425_v10 }
 0x28c   : > { %v507_v24 = vpop.permute.xlu1 %506 }
 0x28d   : > { %v508_v25 = vrot.slane %v507_v24, 1 }
 0x28f   : > { %v510_v27 = vsel %vm509_vm11, %v507_v24, %v508_v25 }
 0x290   : > { %v512_v31 = vadd.f32 %v510_v27, %v478_v28 }
 0x292   : > { %v562_v29 = vpop.permute.xlu1 %561 }
 0x293   : > { %v563_v30 = vrot.slane %v562_v29, 1 }
 0x295   : > { %v565_v32 = vsel %vm564_vm12, %v562_v29, %v563_v30 }
 0x296   : > { %v567_v33 = vadd.f32 %v565_v32, %v512_v31 }
 0x298   : > { %v596_v34 = vadd.f32 %v595_v26, %v567_v33 }
 0x29c   : > { %v625_v35 = vpop.permute.xlu0 %624  ;;  %v656_v36 = vpop.permute.xlu1 %655 }
 0x29d   : > { %v626_v37 = vrot.slane %v625_v35, 1  ;;  %v657_v38 = vrot.slane %v656_v36, 1 }
 0x29f   : > { %v627_v39 = vsel %vm509_vm11, %v625_v35, %v626_v37  ;;  %v658_v41 = vsel %vm564_vm12, %v656_v36, %v657_v38 }
 0x2a0   : > { %v629_v40 = vadd.f32 %v627_v39, %v596_v34 }
 0x2a2   : > { %v660_v42 = vadd.f32 %v658_v41, %v629_v40 }
 0x2a4   : > { %v806_v44 = vmul.f32 -1.442695, %v660_v42 }
 0x2a6   : > { %884 = vpow2.f32 %v806_v44 }
 0x2b0   : > { %v885_v45 = vpop.eup %884 }
 0x2b1   : > { %v664_v46 = vadd.f32 1.0, %v885_v45 }
 0x2b3   : > { %886 = vrcp.f32 %v664_v46 }
 0x2bd   : > { %v887_v52 = vpop.eup %886 }
 0x2be   : > { %v679_v53 = vrot.slane %v887_v52, %v678_v48  ;;  %v671_v54 = vrot.slane %v887_v52, %v670_v49  ;;  %v675_v56 = vrot.slane %v887_v52, %v674_v50 }
 0x2c0   : > { %683 = vrot.lane.b32.xlu1 %v679_v53, %s984_s15  ;;  %v680_v57 = vcombine.low %v671_v54, %v675_v56 }
 0x2c2   : > { %681 = vrot.lane.b32.xlu0 %v680_v57, %s984_s15 }
 0x332   : > { %v684_v55 = vpop.permute.xlu1 %683 }
 0x333   : > { %v686_v59 = vrot.slane %v684_v55, 4 }
 0x334   : > { %v682_v58 = vpop.permute.xlu0 %681 }
 0x335   : > { %v685_v60 = vrot.slane %v682_v58, 4 }
 0x337   : > { %v687_v43 = vsel %vm244_vm0, %v685_v60, %v686_v59 }
 0x338   : > { %v689_v61 = vsel %vm688_vm13, %v682_v58, %v687_v43 }
 0x339   : > { %v691_v63 = vmul.f32 %v689_v61, %v1112_v47 }
 0x33b   : > { %692 = vst [vmem:[%s234_s19] sm:$0xff] %v691_v63 }
 0x33c   : > { %916 = shalt.err (!%p913_p2)
}
 0x33d   : > { %s917_s11 = scalar_lea.hbm %s1205_s6, 128  ;;  %s921_s14 = scalar_lea.hbm %s1252_s5, 256 }
 0x33e   : > { %p918_p3 = scmp.ne.s32.totalorder %s1205_s6, %s917_s11  ;;  %p922_p8 = scmp.lt.u32.totalorder %s1205_s6, %s1252_s5 }
 0x33f   : > { %p923_p11 = scmp.lt.u32.totalorder %s921_s14, %s917_s11  ;;  %p925_p10 = scmp.lt.u32.totalorder %s917_s11, %s1205_s6 }
 0x340   : > { %p919_p4 = pnand %p918_p3, %p1057_p5 }
 0x341   : > { %p924_p9 = por %p923_p11, %p922_p8 }
 0x342   : > { %p920_p7 = pneg %p919_p4 }
 0x343   : > { %p926_p12 = por %p925_p10, %p924_p9 }
 0x345   : > { %p927_p13 = pnand %p926_p12, %p920_p7 }
 0x347   : > { %930 = shalt.err (!%p927_p13)
}
 0x348   : > { %818 = dma.vmem_to_hbm [thread:$0]  (%p1057_p5), %s1207_s24, 128, %s1205_s6, %s694_s7  }
 0x349 PF: > { %p830_p0 = scmp.ge.s32.totalorder %s969_s23, 2  ;;  %s720_s17 = sand.u32 1, %s957_s20  }
 0x34a   : > { %s721_s18 = scalar_lea.sflag [#allocation5], %s720_s17 }
 0x34b   : > { %p825_p1 = pnand %p830_p0, %p1061_p6 }
 0x34d   : > { %952 = dma.done.wait (!%p825_p1), %s721_s18, 128  }
 0x34e   : > { %954 = vsyncadd (!%p825_p1), %s721_s18, 4294967168  ;;  %p17_p2 = scmp.ge.s32.totalorder %s1044_s25, 4   ;;  %s1257_s20 = smov %s961_s21 }
 0x34f   : > { %s1258_s21 = smov %s965_s22  ;;  %s1259_s22 = smov %s1055_s28 }
 0x350   : > { %s1260_s23 = smov %s1044_s25  ;;  %19 = sbr.rel (!%p17_p2) target bundleno = 6 (0x6), region = 85 }
 0x357   :  { %726 = vsyncpa [#allocation5], 1 }
 0x358   :  { %728 = vsyncpa [#allocation5 + $0x1], 1 }
 0x359   :  { %729 = vsyncpa [#allocation6], 1 }
 0x35a   :  { %731 = vsyncpa [#allocation6 + $0x1], 1 }

</bundles_post_ra>
